<compile_context>
chip_gen: v7x
topology: tpu7x:2x2x1
jax: 0.10.0
libtpu: 0.0.40
codegen_flags: <defaults>
</compile_context>

<pallas_src>
import functools
import math

import numpy as np

import jax
import jax.numpy as jnp
from jax.experimental import pallas as pl
from jax.experimental.pallas import tpu as pltpu


# ----------------------------------------------------------------------------
# helpers
# ----------------------------------------------------------------------------
def _pick_tile(dim, candidates):
    """Largest candidate that evenly divides `dim`, else the full dim.

    Full-dim blocks are always legal; the candidates are multiples of the
    (16, 128) bf16 / (8, 128) f32 tiling so tiled blocks are legal too.
    """
    for c in candidates:
        if dim % c == 0:
            return c
    return dim  # full dimension -> always a legal block size


_ROW_TILES = (256, 128, 64, 32, 16)   # second-to-minor (multiples of 16)
_COL_TILES = (512, 256, 128)          # minor / lane dim (multiples of 128)


# ----------------------------------------------------------------------------
# tiled linear:  out = x @ w_t + b      (x: (N,K) bf16, w_t: (K,M) bf16)
# ----------------------------------------------------------------------------
def _linear_kernel(x_ref, w_ref, b_ref, o_ref, acc_ref):
    kk = pl.program_id(2)

    @pl.when(kk == 0)
    def _():
        acc_ref[...] = jnp.zeros_like(acc_ref)

    acc_ref[...] += jnp.dot(x_ref[...], w_ref[...],
                            preferred_element_type=jnp.float32)

    @pl.when(kk == pl.num_programs(2) - 1)
    def _():
        o_ref[...] = (acc_ref[...] + b_ref[...]).astype(o_ref.dtype)


def linear(x, w_t, b, out_dtype=jnp.float32):
    """x: (N, K) bf16, w_t: (K, M) bf16 (pre-transposed), b: (M,) f32."""
    N, K = x.shape
    K2, M = w_t.shape
    assert K == K2
    tr = _pick_tile(N, _ROW_TILES)
    tc = _pick_tile(M, _COL_TILES)
    tk = _pick_tile(K, _COL_TILES)
    b2 = b.reshape(1, M).astype(jnp.float32)

    out_bytes = np.dtype(out_dtype).itemsize
    cost = pl.CostEstimate(
        flops=2 * N * M * K,
        transcendentals=0,
        bytes_accessed=N * K * 2 + K * M * 2 + M * 4 + N * M * out_bytes,
    )
    return pl.pallas_call(
        _linear_kernel,
        out_shape=jax.ShapeDtypeStruct((N, M), out_dtype),
        grid=(N // tr, M // tc, K // tk),
        in_specs=[
            pl.BlockSpec((tr, tk), lambda i, j, kk: (i, kk)),
            pl.BlockSpec((tk, tc), lambda i, j, kk: (kk, j)),
            pl.BlockSpec((1, tc), lambda i, j, kk: (0, j)),
        ],
        out_specs=pl.BlockSpec((tr, tc), lambda i, j, kk: (i, j)),
        scratch_shapes=[pltpu.VMEM((tr, tc), jnp.float32)],
        compiler_params=pltpu.CompilerParams(
            dimension_semantics=("parallel", "parallel", "arbitrary")),
        cost_estimate=cost,
    )(x, w_t, b2)


# ----------------------------------------------------------------------------
# flash-style multi-head attention
#   q, k, v: (B, T, E) bf16, heads packed along the lane (E = H*D) axis.
#   output : (B, T, E) bf16, written lane-dense per q-tile.
# ----------------------------------------------------------------------------
def _flash_attn_kernel(q_ref, k_ref, v_ref, o_ref, m_ref, l_ref, acc_ref,
                       *, scaling, num_heads):
    ki = pl.program_id(2)
    head_dim = q_ref.shape[-1] // num_heads

    @pl.when(ki == 0)
    def _():
        m_ref[...] = jnp.full(m_ref.shape, -jnp.inf, jnp.float32)
        l_ref[...] = jnp.zeros(l_ref.shape, jnp.float32)
        acc_ref[...] = jnp.zeros(acc_ref.shape, jnp.float32)

    q = q_ref[0]   # (tq,  E) bf16
    k = k_ref[0]   # (tkv, E) bf16
    v = v_ref[0]   # (tkv, E) bf16

    # TODO(synk): for very large head counts a batched dot_general (or
    # lax.fori_loop) over heads would bound live ranges better than unrolling.
    for h in range(num_heads):
        lo = h * head_dim
        hi = lo + head_dim
        # fold scaling into q: tq*D multiplies, not tq*tkv.
        q_h = q[:, lo:hi] * scaling            # bf16
        k_h = k[:, lo:hi]
        v_h = v[:, lo:hi]

        # scores on the MXU, accumulated in f32.
        s = jax.lax.dot_general(
            q_h, k_h, (((1,), (1,)), ((), ())),
            preferred_element_type=jnp.float32)          # (tq, tkv) f32

        # online softmax (f32).
        m_prev = m_ref[h]                                 # (tq, 1)
        m_new = jnp.maximum(m_prev, jnp.max(s, axis=-1, keepdims=True))
        alpha = jnp.exp(m_prev - m_new)
        p = jnp.exp(s - m_new)
        l_ref[h] = alpha * l_ref[h] + jnp.sum(p, axis=-1, keepdims=True)

        pv = jax.lax.dot_general(
            p.astype(v_h.dtype), v_h, (((1,), (0,)), ((), ())),
            preferred_element_type=jnp.float32)           # (tq, D) f32
        acc_ref[h] = alpha * acc_ref[h] + pv
        m_ref[h] = m_new

    @pl.when(ki == pl.num_programs(2) - 1)
    def _():
        outs = []
        for h in range(num_heads):
            inv_l = pl.reciprocal(l_ref[h], approx=True)  # EUP slot, ~free
            outs.append(acc_ref[h] * inv_l)
        # single lane-dense (tq, E) store.
        o_ref[0] = jnp.concatenate(outs, axis=-1).astype(o_ref.dtype)


def flash_attention(q, k, v, *, num_heads, scaling):
    """q, k, v: (B, T, E) bf16 -> context (B, T, E) bf16."""
    B, T, E = q.shape
    S = k.shape[1]
    D = E // num_heads
    tq = _pick_tile(T, _ROW_TILES)
    tkv = _pick_tile(S, _ROW_TILES)
    # TODO(synk): ragged S (not divisible by 128 and too large for a full-dim
    # block) would need in-kernel masking of the padded kv rows.

    kern = functools.partial(_flash_attn_kernel, scaling=scaling,
                             num_heads=num_heads)
    cost = pl.CostEstimate(
        flops=4 * B * num_heads * T * S * D,
        transcendentals=B * num_heads * T * S,
        bytes_accessed=(3 * B * S * E + B * T * E) * 2 + B * T * E * 2,
    )
    return pl.pallas_call(
        kern,
        out_shape=jax.ShapeDtypeStruct((B, T, E), jnp.bfloat16),
        grid=(B, T // tq, S // tkv),
        in_specs=[
            pl.BlockSpec((1, tq, E), lambda b, qi, ki: (b, qi, 0)),
            pl.BlockSpec((1, tkv, E), lambda b, qi, ki: (b, ki, 0)),
            pl.BlockSpec((1, tkv, E), lambda b, qi, ki: (b, ki, 0)),
        ],
        out_specs=pl.BlockSpec((1, tq, E), lambda b, qi, ki: (b, qi, 0)),
        scratch_shapes=[
            pltpu.VMEM((num_heads, tq, 1), jnp.float32),   # running max
            pltpu.VMEM((num_heads, tq, 1), jnp.float32),   # running denom
            pltpu.VMEM((num_heads, tq, D), jnp.float32),   # running context
        ],
        compiler_params=pltpu.CompilerParams(
            dimension_semantics=("parallel", "parallel", "arbitrary")),
        cost_estimate=cost,
    )(q, k, v)


# ----------------------------------------------------------------------------
# Module wrapper (self_attention=True, bias=True, dropout=0.0, eval mode,
# no masks, no incremental state, need_weights=False)
# ----------------------------------------------------------------------------
class FastCompatibleMultiheadAttentionPallas:
    def __init__(self, embed_dim, num_heads, key):
        self.embed_dim = embed_dim
        self.num_heads = num_heads
        self.head_dim = embed_dim // num_heads
        assert self.head_dim * num_heads == embed_dim
        self.scaling = self.head_dim ** (-0.5)

        k1, k2 = jax.random.split(key)
        # nn.init.uniform_(in_proj_weight, -sqrt(3/E/2), sqrt(3/E/2))
        bound_in = math.sqrt(3.0 / embed_dim / 2.0)
        self.in_proj_weight = jax.random.uniform(
            k1, (3 * embed_dim, embed_dim), jnp.float32,
            minval=-bound_in, maxval=bound_in)
        self.in_proj_bias = jnp.zeros((3 * embed_dim,), jnp.float32)
        # xavier_uniform_(out_proj_weight)
        bound_out = math.sqrt(6.0 / (embed_dim + embed_dim))
        self.out_proj_weight = jax.random.uniform(
            k2, (embed_dim, embed_dim), jnp.float32,
            minval=-bound_out, maxval=bound_out)
        self.out_proj_bias = jnp.zeros((embed_dim,), jnp.float32)

        # ---- one-time kernel-ready parameter layouts ----
        H, D, E = num_heads, self.head_dim, embed_dim
        # apex "fast" interleave: row index = h*3D + j*D + d, j in {q,k,v}
        w3 = self.in_proj_weight.reshape(H, 3, D, E)
        b3 = self.in_proj_bias.reshape(H, 3, D)
        # per-projection weights, pre-transposed to (K, M), bf16 (MXU native)
        self.wq_t = jnp.transpose(w3[:, 0].reshape(E, E)).astype(jnp.bfloat16)
        self.wk_t = jnp.transpose(w3[:, 1].reshape(E, E)).astype(jnp.bfloat16)
        self.wv_t = jnp.transpose(w3[:, 2].reshape(E, E)).astype(jnp.bfloat16)
        self.bq = b3[:, 0].reshape(E)
        self.bk = b3[:, 1].reshape(E)
        self.bv = b3[:, 2].reshape(E)
        self.wo_t = jnp.transpose(self.out_proj_weight).astype(jnp.bfloat16)
        self.bo = self.out_proj_bias

    def __call__(self, query):
        # query: (tgt_len, bsz, embed_dim)
        T, B, E = query.shape
        H = self.num_heads

        # single lane-dense layout change; everything downstream is (B, T, E).
        x = jnp.transpose(query, (1, 0, 2)).reshape(B * T, E)
        x = x.astype(jnp.bfloat16)

        # ---- Q/K/V projections (tiled bf16 Pallas matmuls) ----
        q = linear(x, self.wq_t, self.bq, out_dtype=jnp.bfloat16).reshape(B, T, E)
        k = linear(x, self.wk_t, self.bk, out_dtype=jnp.bfloat16).reshape(B, T, E)
        v = linear(x, self.wv_t, self.bv, out_dtype=jnp.bfloat16).reshape(B, T, E)

        # ---- flash attention (Pallas, online softmax, lane-dense output) ----
        ctx = flash_attention(q, k, v, num_heads=H, scaling=self.scaling)

        # ---- output projection (tiled bf16 Pallas matmul, f32 out) ----
        out = linear(ctx.reshape(B * T, E), self.wo_t, self.bo,
                     out_dtype=jnp.float32)
        return jnp.transpose(out.reshape(B, T, E), (1, 0, 2))

    # pure-JAX f32 reference replicating the PyTorch math, for verification
    def reference(self, query):
        T, B, E = query.shape
        H, D = self.num_heads, self.head_dim
        x2d = query.reshape(T * B, E)
        qkv = x2d @ self.in_proj_weight.T + self.in_proj_bias
        qkv = qkv.reshape(T, B * H, 3, D)
        q = jnp.transpose(qkv[:, :, 0, :], (1, 0, 2))
        k = jnp.transpose(qkv[:, :, 1, :], (1, 0, 2))
        v = jnp.transpose(qkv[:, :, 2, :], (1, 0, 2))
        s = jnp.einsum('btd,bsd->bts', q, k) * self.scaling
        p = jax.nn.softmax(s.astype(jnp.float32), axis=-1)
        ctx = jnp.einsum('bts,bsd->btd', p, v)
        ctx = jnp.transpose(ctx, (1, 0, 2)).reshape(T * B, E)
        out = ctx @ self.out_proj_weight.T + self.out_proj_bias
        return out.reshape(T, B, E)


# TODO(synk): incremental_state / key_padding_mask / attn_mask / dropout /
# need_weights paths are not exercised here (eval-mode self-attention only).

if __name__ == "__main__":
    embed_dim = 32
    num_heads = 4
    tgt_len = 8
    bsz = 2

    key = jax.random.PRNGKey(0)
    k_param, k_input = jax.random.split(key)

    attn = FastCompatibleMultiheadAttentionPallas(embed_dim, num_heads, k_param)
    query = jax.random.normal(k_input, (tgt_len, bsz, embed_dim), jnp.float32)

    fwd = jax.jit(attn.__call__)
    out = jax.block_until_ready(fwd(query))

    ref = attn.reference(query)
    assert out.shape == (tgt_len, bsz, embed_dim)
    # bf16 MXU operands + approx reciprocal -> compare against the f32
    # reference with bf16-level tolerance.
    max_err = jnp.max(jnp.abs(out - ref))
    assert jnp.allclose(out, ref, atol=5e-2, rtol=5e-2), \
        f"max abs err {max_err}"

    print("KERNEL_OK")
</pallas_src>

<mosaic_0001>
module attributes {stable_mosaic.version = 11 : i64} {
  func.func @_linear_kernel(%arg0: i32, %arg1: i32, %arg2: i32, %arg3: memref<16x32xbf16, #tpu.memory_space<vmem>>, %arg4: memref<32x32xbf16, #tpu.memory_space<vmem>>, %arg5: memref<1x32xf32, #tpu.memory_space<vmem>>, %arg6: memref<16x32xbf16, #tpu.memory_space<vmem>>, %arg7: memref<16x32xf32, #tpu.memory_space<vmem>>) attributes {dimension_semantics = [#tpu.dimension_semantics<parallel>, #tpu.dimension_semantics<parallel>, #tpu.dimension_semantics<arbitrary>], iteration_bounds = array<i64: 1, 1, 1>, scalar_prefetch = 0 : i64, scratch_operands = 1 : i64, tpu.core_type = #tpu.core_type<tc>, window_params = [{transform_indices = @transform_0, window_bounds = array<i64: 16, 32>}, {transform_indices = @transform_1, window_bounds = array<i64: 32, 32>}, {transform_indices = @transform_2, window_bounds = array<i64: 1, 32>}, {transform_indices = @transform_3, window_bounds = array<i64: 16, 32>}]} {
    %c0_i32 = arith.constant 0 : i32
    %0 = arith.cmpi eq, %arg2, %c0_i32 : i32
    %1 = arith.extui %0 : i1 to i32
    %c0_i32_0 = arith.constant 0 : i32
    %2 = arith.cmpi ne, %1, %c0_i32_0 : i32
    scf.if %2 {
      %cst_10 = arith.constant 0.000000e+00 : f32
      %12 = vector.broadcast %cst_10 : f32 to vector<16x32xf32>
      %c0_11 = arith.constant 0 : index
      %c0_12 = arith.constant 0 : index
      %13 = vector.load %arg7[%c0_11, %c0_12] : memref<16x32xf32, #tpu.memory_space<vmem>>, vector<16x32xf32>
      tpu.vector_store %arg7[%c0_11, %c0_12], %12 {strides = array<i32>} : memref<16x32xf32, #tpu.memory_space<vmem>>, vector<16x32xf32>,
    } else {
    }
    %c0 = arith.constant 0 : index
    %c0_1 = arith.constant 0 : index
    %3 = vector.load %arg7[%c0, %c0_1] : memref<16x32xf32, #tpu.memory_space<vmem>>, vector<16x32xf32>
    %c0_2 = arith.constant 0 : index
    %c0_3 = arith.constant 0 : index
    %4 = vector.load %arg3[%c0_2, %c0_3] : memref<16x32xbf16, #tpu.memory_space<vmem>>, vector<16x32xbf16>
    %c0_4 = arith.constant 0 : index
    %c0_5 = arith.constant 0 : index
    %5 = vector.load %arg4[%c0_4, %c0_5] : memref<32x32xbf16, #tpu.memory_space<vmem>>, vector<32x32xbf16>
    %cst = arith.constant dense<0.000000e+00> : vector<16x32xf32>
    %6 = tpu.matmul %4, %5, %cst {dimension_numbers = #tpu.dot_dimension_numbers<[1], [0], [0], [1], [0, 0, 1, 1], [], []>} : vector<16x32xbf16>, vector<32x32xbf16>, vector<16x32xf32> -> vector<16x32xf32>
    %7 = arith.addf %3, %6 : vector<16x32xf32>
    %c0_6 = arith.constant 0 : index
    %c0_7 = arith.constant 0 : index
    %8 = vector.load %arg7[%c0_6, %c0_7] : memref<16x32xf32, #tpu.memory_space<vmem>>, vector<16x32xf32>
    tpu.vector_store %arg7[%c0_6, %c0_7], %7 {strides = array<i32>} : memref<16x32xf32, #tpu.memory_space<vmem>>, vector<16x32xf32>,
    %c0_i32_8 = arith.constant 0 : i32
    %9 = arith.cmpi eq, %arg2, %c0_i32_8 : i32
    %10 = arith.extui %9 : i1 to i32
    %c0_i32_9 = arith.constant 0 : i32
    %11 = arith.cmpi ne, %10, %c0_i32_9 : i32
    scf.if %11 {
      %c0_10 = arith.constant 0 : index
      %c0_11 = arith.constant 0 : index
      %12 = vector.load %arg7[%c0_10, %c0_11] : memref<16x32xf32, #tpu.memory_space<vmem>>, vector<16x32xf32>
      %c0_12 = arith.constant 0 : index
      %c0_13 = arith.constant 0 : index
      %13 = vector.load %arg5[%c0_12, %c0_13] : memref<1x32xf32, #tpu.memory_space<vmem>>, vector<1x32xf32>
      %14 = vector.broadcast %13 : vector<1x32xf32> to vector<16x32xf32>
      %15 = arith.addf %12, %14 : vector<16x32xf32>
      %16 = arith.truncf %15 : vector<16x32xf32> to vector<16x32xbf16>
      %c0_14 = arith.constant 0 : index
      %c0_15 = arith.constant 0 : index
      %17 = vector.load %arg6[%c0_14, %c0_15] : memref<16x32xbf16, #tpu.memory_space<vmem>>, vector<16x32xbf16>
      tpu.vector_store %arg6[%c0_14, %c0_15], %16 {strides = array<i32>} : memref<16x32xbf16, #tpu.memory_space<vmem>>, vector<16x32xbf16>,
    } else {
    }
    return
  }
  func.func @transform_0(%arg0: i32, %arg1: i32, %arg2: i32) -> (i32, i32) {
    %c0_i32 = arith.constant 0 : i32
    return %arg0, %arg2 : i32, i32
  }
  func.func @transform_1(%arg0: i32, %arg1: i32, %arg2: i32) -> (i32, i32) {
    %c0_i32 = arith.constant 0 : i32
    return %arg2, %arg1 : i32, i32
  }
  func.func @transform_2(%arg0: i32, %arg1: i32, %arg2: i32) -> (i32, i32) {
    %c0_i32 = arith.constant 0 : i32
    %c0_i32_0 = arith.constant 0 : i32
    return %c0_i32, %arg1 : i32, i32
  }
  func.func @transform_3(%arg0: i32, %arg1: i32, %arg2: i32) -> (i32, i32) {
    %c0_i32 = arith.constant 0 : i32
    return %arg0, %arg1 : i32, i32
  }
}

module attributes {stable_mosaic.version = 11 : i64} {
  func.func @_linear_kernel(%arg0: i32, %arg1: i32, %arg2: i32, %arg3: memref<16x32xbf16, #tpu.memory_space<vmem>>, %arg4: memref<32x32xbf16, #tpu.memory_space<vmem>>, %arg5: memref<1x32xf32, #tpu.memory_space<vmem>>, %arg6: memref<16x32xf32, #tpu.memory_space<vmem>>, %arg7: memref<16x32xf32, #tpu.memory_space<vmem>>) attributes {dimension_semantics = [#tpu.dimension_semantics<parallel>, #tpu.dimension_semantics<parallel>, #tpu.dimension_semantics<arbitrary>], iteration_bounds = array<i64: 1, 1, 1>, scalar_prefetch = 0 : i64, scratch_operands = 1 : i64, tpu.core_type = #tpu.core_type<tc>, window_params = [{transform_indices = @transform_0, window_bounds = array<i64: 16, 32>}, {transform_indices = @transform_1, window_bounds = array<i64: 32, 32>}, {transform_indices = @transform_2, window_bounds = array<i64: 1, 32>}, {transform_indices = @transform_3, window_bounds = array<i64: 16, 32>}]} {
    %c0_i32 = arith.constant 0 : i32
    %0 = arith.cmpi eq, %arg2, %c0_i32 : i32
    %1 = arith.extui %0 : i1 to i32
    %c0_i32_0 = arith.constant 0 : i32
    %2 = arith.cmpi ne, %1, %c0_i32_0 : i32
    scf.if %2 {
      %cst_10 = arith.constant 0.000000e+00 : f32
      %12 = vector.broadcast %cst_10 : f32 to vector<16x32xf32>
      %c0_11 = arith.constant 0 : index
      %c0_12 = arith.constant 0 : index
      %13 = vector.load %arg7[%c0_11, %c0_12] : memref<16x32xf32, #tpu.memory_space<vmem>>, vector<16x32xf32>
      tpu.vector_store %arg7[%c0_11, %c0_12], %12 {strides = array<i32>} : memref<16x32xf32, #tpu.memory_space<vmem>>, vector<16x32xf32>,
    } else {
    }
    %c0 = arith.constant 0 : index
    %c0_1 = arith.constant 0 : index
    %3 = vector.load %arg7[%c0, %c0_1] : memref<16x32xf32, #tpu.memory_space<vmem>>, vector<16x32xf32>
    %c0_2 = arith.constant 0 : index
    %c0_3 = arith.constant 0 : index
    %4 = vector.load %arg3[%c0_2, %c0_3] : memref<16x32xbf16, #tpu.memory_space<vmem>>, vector<16x32xbf16>
    %c0_4 = arith.constant 0 : index
    %c0_5 = arith.constant 0 : index
    %5 = vector.load %arg4[%c0_4, %c0_5] : memref<32x32xbf16, #tpu.memory_space<vmem>>, vector<32x32xbf16>
    %cst = arith.constant dense<0.000000e+00> : vector<16x32xf32>
    %6 = tpu.matmul %4, %5, %cst {dimension_numbers = #tpu.dot_dimension_numbers<[1], [0], [0], [1], [0, 0, 1, 1], [], []>} : vector<16x32xbf16>, vector<32x32xbf16>, vector<16x32xf32> -> vector<16x32xf32>
    %7 = arith.addf %3, %6 : vector<16x32xf32>
    %c0_6 = arith.constant 0 : index
    %c0_7 = arith.constant 0 : index
    %8 = vector.load %arg7[%c0_6, %c0_7] : memref<16x32xf32, #tpu.memory_space<vmem>>, vector<16x32xf32>
    tpu.vector_store %arg7[%c0_6, %c0_7], %7 {strides = array<i32>} : memref<16x32xf32, #tpu.memory_space<vmem>>, vector<16x32xf32>,
    %c0_i32_8 = arith.constant 0 : i32
    %9 = arith.cmpi eq, %arg2, %c0_i32_8 : i32
    %10 = arith.extui %9 : i1 to i32
    %c0_i32_9 = arith.constant 0 : i32
    %11 = arith.cmpi ne, %10, %c0_i32_9 : i32
    scf.if %11 {
      %c0_10 = arith.constant 0 : index
      %c0_11 = arith.constant 0 : index
      %12 = vector.load %arg7[%c0_10, %c0_11] : memref<16x32xf32, #tpu.memory_space<vmem>>, vector<16x32xf32>
      %c0_12 = arith.constant 0 : index
      %c0_13 = arith.constant 0 : index
      %13 = vector.load %arg5[%c0_12, %c0_13] : memref<1x32xf32, #tpu.memory_space<vmem>>, vector<1x32xf32>
      %14 = vector.broadcast %13 : vector<1x32xf32> to vector<16x32xf32>
      %15 = arith.addf %12, %14 : vector<16x32xf32>
      %c0_14 = arith.constant 0 : index
      %c0_15 = arith.constant 0 : index
      %16 = vector.load %arg6[%c0_14, %c0_15] : memref<16x32xf32, #tpu.memory_space<vmem>>, vector<16x32xf32>
      tpu.vector_store %arg6[%c0_14, %c0_15], %15 {strides = array<i32>} : memref<16x32xf32, #tpu.memory_space<vmem>>, vector<16x32xf32>,
    } else {
    }
    return
  }
  func.func @transform_0(%arg0: i32, %arg1: i32, %arg2: i32) -> (i32, i32) {
    %c0_i32 = arith.constant 0 : i32
    return %arg0, %arg2 : i32, i32
  }
  func.func @transform_1(%arg0: i32, %arg1: i32, %arg2: i32) -> (i32, i32) {
    %c0_i32 = arith.constant 0 : i32
    return %arg2, %arg1 : i32, i32
  }
  func.func @transform_2(%arg0: i32, %arg1: i32, %arg2: i32) -> (i32, i32) {
    %c0_i32 = arith.constant 0 : i32
    %c0_i32_0 = arith.constant 0 : i32
    return %c0_i32, %arg1 : i32, i32
  }
  func.func @transform_3(%arg0: i32, %arg1: i32, %arg2: i32) -> (i32, i32) {
    %c0_i32 = arith.constant 0 : i32
    return %arg0, %arg1 : i32, i32
  }
}

module attributes {stable_mosaic.version = 11 : i64} {
  func.func @_flash_attn_kernel(%arg0: i32, %arg1: i32, %arg2: i32, %arg3: memref<1x8x32xbf16, #tpu.memory_space<vmem>>, %arg4: memref<1x8x32xbf16, #tpu.memory_space<vmem>>, %arg5: memref<1x8x32xbf16, #tpu.memory_space<vmem>>, %arg6: memref<1x8x32xbf16, #tpu.memory_space<vmem>>, %arg7: memref<4x8x1xf32, #tpu.memory_space<vmem>>, %arg8: memref<4x8x1xf32, #tpu.memory_space<vmem>>, %arg9: memref<4x8x8xf32, #tpu.memory_space<vmem>>) attributes {dimension_semantics = [#tpu.dimension_semantics<parallel>, #tpu.dimension_semantics<parallel>, #tpu.dimension_semantics<arbitrary>], iteration_bounds = array<i64: 2, 1, 1>, scalar_prefetch = 0 : i64, scratch_operands = 3 : i64, tpu.core_type = #tpu.core_type<tc>, window_params = [{transform_indices = @transform_0, window_bounds = array<i64: 1, 8, 32>}, {transform_indices = @transform_1, window_bounds = array<i64: 1, 8, 32>}, {transform_indices = @transform_2, window_bounds = array<i64: 1, 8, 32>}, {transform_indices = @transform_3, window_bounds = array<i64: 1, 8, 32>}]} {
    %c0_i32 = arith.constant 0 : i32
    %0 = arith.cmpi eq, %arg2, %c0_i32 : i32
    %1 = arith.extui %0 : i1 to i32
    %c0_i32_0 = arith.constant 0 : i32
    %2 = arith.cmpi ne, %1, %c0_i32_0 : i32
    scf.if %2 {
      %cst_99 = arith.constant 0xFF800000 : f32
      %164 = vector.broadcast %cst_99 : f32 to vector<4x8x1xf32>
      %c0_100 = arith.constant 0 : index
      %c0_101 = arith.constant 0 : index
      %c0_102 = arith.constant 0 : index
      %165 = vector.load %arg7[%c0_100, %c0_101, %c0_102] : memref<4x8x1xf32, #tpu.memory_space<vmem>>, vector<4x8x1xf32>
      tpu.vector_store %arg7[%c0_100, %c0_101, %c0_102], %164 {strides = array<i32>} : memref<4x8x1xf32, #tpu.memory_space<vmem>>, vector<4x8x1xf32>,
      %cst_103 = arith.constant 0.000000e+00 : f32
      %166 = vector.broadcast %cst_103 : f32 to vector<4x8x1xf32>
      %c0_104 = arith.constant 0 : index
      %c0_105 = arith.constant 0 : index
      %c0_106 = arith.constant 0 : index
      %167 = vector.load %arg8[%c0_104, %c0_105, %c0_106] : memref<4x8x1xf32, #tpu.memory_space<vmem>>, vector<4x8x1xf32>
      tpu.vector_store %arg8[%c0_104, %c0_105, %c0_106], %166 {strides = array<i32>} : memref<4x8x1xf32, #tpu.memory_space<vmem>>, vector<4x8x1xf32>,
      %cst_107 = arith.constant 0.000000e+00 : f32
      %168 = vector.broadcast %cst_107 : f32 to vector<4x8x8xf32>
      %c0_108 = arith.constant 0 : index
      %c0_109 = arith.constant 0 : index
      %c0_110 = arith.constant 0 : index
      %169 = vector.load %arg9[%c0_108, %c0_109, %c0_110] : memref<4x8x8xf32, #tpu.memory_space<vmem>>, vector<4x8x8xf32>
      tpu.vector_store %arg9[%c0_108, %c0_109, %c0_110], %168 {strides = array<i32>} : memref<4x8x8xf32, #tpu.memory_space<vmem>>, vector<4x8x8xf32>,
    } else {
    }
    %c0 = arith.constant 0 : index
    %c0_1 = arith.constant 0 : index
    %c0_2 = arith.constant 0 : index
    %3 = vector.load %arg3[%c0, %c0_1, %c0_2] : memref<1x8x32xbf16, #tpu.memory_space<vmem>>, vector<1x8x32xbf16>
    %4 = vector.shape_cast %3 : vector<1x8x32xbf16> to vector<8x32xbf16>
    %c0_3 = arith.constant 0 : index
    %c0_4 = arith.constant 0 : index
    %c0_5 = arith.constant 0 : index
    %5 = vector.load %arg4[%c0_3, %c0_4, %c0_5] : memref<1x8x32xbf16, #tpu.memory_space<vmem>>, vector<1x8x32xbf16>
    %6 = vector.shape_cast %5 : vector<1x8x32xbf16> to vector<8x32xbf16>
    %c0_6 = arith.constant 0 : index
    %c0_7 = arith.constant 0 : index
    %c0_8 = arith.constant 0 : index
    %7 = vector.load %arg5[%c0_6, %c0_7, %c0_8] : memref<1x8x32xbf16, #tpu.memory_space<vmem>>, vector<1x8x32xbf16>
    %8 = vector.shape_cast %7 : vector<1x8x32xbf16> to vector<8x32xbf16>
    %9 = vector.extract_strided_slice %4 {offsets = [0, 0], sizes = [8, 8], strides = [1, 1]} : vector<8x32xbf16> to vector<8x8xbf16>
    %cst = arith.constant 3.535160e-01 : bf16
    %10 = vector.broadcast %cst : bf16 to vector<8x8xbf16>
    %11 = arith.mulf %9, %10 : vector<8x8xbf16>
    %12 = vector.extract_strided_slice %6 {offsets = [0, 0], sizes = [8, 8], strides = [1, 1]} : vector<8x32xbf16> to vector<8x8xbf16>
    %13 = vector.extract_strided_slice %8 {offsets = [0, 0], sizes = [8, 8], strides = [1, 1]} : vector<8x32xbf16> to vector<8x8xbf16>
    %cst_9 = arith.constant dense<0.000000e+00> : vector<8x8xf32>
    %14 = tpu.matmul %11, %12, %cst_9 {dimension_numbers = #tpu.dot_dimension_numbers<[1], [1], [0], [0], [0, 0, 1, 0], [], []>} : vector<8x8xbf16>, vector<8x8xbf16>, vector<8x8xf32> -> vector<8x8xf32>
    %c0_10 = arith.constant 0 : index
    %c0_11 = arith.constant 0 : index
    %c0_12 = arith.constant 0 : index
    %15 = vector.load %arg7[%c0_10, %c0_11, %c0_12] : memref<4x8x1xf32, #tpu.memory_space<vmem>>, vector<1x8x1xf32>
    %16 = vector.shape_cast %15 : vector<1x8x1xf32> to vector<8x1xf32>
    %cst_13 = arith.constant dense<0xFF800000> : vector<8xf32>
    %17 = vector.multi_reduction <maximumf>, %14, %cst_13 [1] : vector<8x8xf32> to vector<8xf32>
    %18 = vector.shape_cast %17 : vector<8xf32> to vector<8x1xf32>
    %19 = arith.maximumf %16, %18 : vector<8x1xf32>
    %20 = arith.subf %16, %19 : vector<8x1xf32>
    %21 = math.exp %20 : vector<8x1xf32>
    %22 = vector.broadcast %19 : vector<8x1xf32> to vector<8x8xf32>
    %23 = arith.subf %14, %22 : vector<8x8xf32>
    %24 = math.exp %23 : vector<8x8xf32>
    %c0_14 = arith.constant 0 : index
    %c0_15 = arith.constant 0 : index
    %c0_16 = arith.constant 0 : index
    %25 = vector.load %arg8[%c0_14, %c0_15, %c0_16] : memref<4x8x1xf32, #tpu.memory_space<vmem>>, vector<1x8x1xf32>
    %26 = vector.shape_cast %25 : vector<1x8x1xf32> to vector<8x1xf32>
    %27 = arith.mulf %21, %26 : vector<8x1xf32>
    %cst_17 = arith.constant dense<0.000000e+00> : vector<8xf32>
    %28 = vector.multi_reduction <add>, %24, %cst_17 [1] : vector<8x8xf32> to vector<8xf32>
    %29 = vector.shape_cast %28 : vector<8xf32> to vector<8x1xf32>
    %30 = arith.addf %27, %29 : vector<8x1xf32>
    %c0_18 = arith.constant 0 : index
    %c0_19 = arith.constant 0 : index
    %c0_20 = arith.constant 0 : index
    %31 = vector.load %arg8[%c0_18, %c0_19, %c0_20] : memref<4x8x1xf32, #tpu.memory_space<vmem>>, vector<1x8x1xf32>
    %32 = vector.shape_cast %31 : vector<1x8x1xf32> to vector<8x1xf32>
    %33 = vector.shape_cast %30 : vector<8x1xf32> to vector<1x8x1xf32>
    tpu.vector_store %arg8[%c0_18, %c0_19, %c0_20], %33 {strides = array<i32>} : memref<4x8x1xf32, #tpu.memory_space<vmem>>, vector<1x8x1xf32>,
    %34 = arith.truncf %24 : vector<8x8xf32> to vector<8x8xbf16>
    %cst_21 = arith.constant dense<0.000000e+00> : vector<8x8xf32>
    %35 = tpu.matmul %34, %13, %cst_21 {dimension_numbers = #tpu.dot_dimension_numbers<[1], [0], [0], [1], [0, 0, 1, 1], [], []>} : vector<8x8xbf16>, vector<8x8xbf16>, vector<8x8xf32> -> vector<8x8xf32>
    %c0_22 = arith.constant 0 : index
    %c0_23 = arith.constant 0 : index
    %c0_24 = arith.constant 0 : index
    %36 = vector.load %arg9[%c0_22, %c0_23, %c0_24] : memref<4x8x8xf32, #tpu.memory_space<vmem>>, vector<1x8x8xf32>
    %37 = vector.shape_cast %36 : vector<1x8x8xf32> to vector<8x8xf32>
    %38 = vector.broadcast %21 : vector<8x1xf32> to vector<8x8xf32>
    %39 = arith.mulf %38, %37 : vector<8x8xf32>
    %40 = arith.addf %39, %35 : vector<8x8xf32>
    %c0_25 = arith.constant 0 : index
    %c0_26 = arith.constant 0 : index
    %c0_27 = arith.constant 0 : index
    %41 = vector.load %arg9[%c0_25, %c0_26, %c0_27] : memref<4x8x8xf32, #tpu.memory_space<vmem>>, vector<1x8x8xf32>
    %42 = vector.shape_cast %41 : vector<1x8x8xf32> to vector<8x8xf32>
    %43 = vector.shape_cast %40 : vector<8x8xf32> to vector<1x8x8xf32>
    tpu.vector_store %arg9[%c0_25, %c0_26, %c0_27], %43 {strides = array<i32>} : memref<4x8x8xf32, #tpu.memory_space<vmem>>, vector<1x8x8xf32>,
    %c0_28 = arith.constant 0 : index
    %c0_29 = arith.constant 0 : index
    %c0_30 = arith.constant 0 : index
    %44 = vector.load %arg7[%c0_28, %c0_29, %c0_30] : memref<4x8x1xf32, #tpu.memory_space<vmem>>, vector<1x8x1xf32>
    %45 = vector.shape_cast %44 : vector<1x8x1xf32> to vector<8x1xf32>
    %46 = vector.shape_cast %19 : vector<8x1xf32> to vector<1x8x1xf32>
    tpu.vector_store %arg7[%c0_28, %c0_29, %c0_30], %46 {strides = array<i32>} : memref<4x8x1xf32, #tpu.memory_space<vmem>>, vector<1x8x1xf32>,
    %47 = vector.extract_strided_slice %4 {offsets = [0, 8], sizes = [8, 8], strides = [1, 1]} : vector<8x32xbf16> to vector<8x8xbf16>
    %cst_31 = arith.constant 3.535160e-01 : bf16
    %48 = vector.broadcast %cst_31 : bf16 to vector<8x8xbf16>
    %49 = arith.mulf %47, %48 : vector<8x8xbf16>
    %50 = vector.extract_strided_slice %6 {offsets = [0, 8], sizes = [8, 8], strides = [1, 1]} : vector<8x32xbf16> to vector<8x8xbf16>
    %51 = vector.extract_strided_slice %8 {offsets = [0, 8], sizes = [8, 8], strides = [1, 1]} : vector<8x32xbf16> to vector<8x8xbf16>
    %cst_32 = arith.constant dense<0.000000e+00> : vector<8x8xf32>
    %52 = tpu.matmul %49, %50, %cst_32 {dimension_numbers = #tpu.dot_dimension_numbers<[1], [1], [0], [0], [0, 0, 1, 0], [], []>} : vector<8x8xbf16>, vector<8x8xbf16>, vector<8x8xf32> -> vector<8x8xf32>
    %c1 = arith.constant 1 : index
    %c0_33 = arith.constant 0 : index
    %c0_34 = arith.constant 0 : index
    %53 = vector.load %arg7[%c1, %c0_33, %c0_34] : memref<4x8x1xf32, #tpu.memory_space<vmem>>, vector<1x8x1xf32>
    %54 = vector.shape_cast %53 : vector<1x8x1xf32> to vector<8x1xf32>
    %cst_35 = arith.constant dense<0xFF800000> : vector<8xf32>
    %55 = vector.multi_reduction <maximumf>, %52, %cst_35 [1] : vector<8x8xf32> to vector<8xf32>
    %56 = vector.shape_cast %55 : vector<8xf32> to vector<8x1xf32>
    %57 = arith.maximumf %54, %56 : vector<8x1xf32>
    %58 = arith.subf %54, %57 : vector<8x1xf32>
    %59 = math.exp %58 : vector<8x1xf32>
    %60 = vector.broadcast %57 : vector<8x1xf32> to vector<8x8xf32>
    %61 = arith.subf %52, %60 : vector<8x8xf32>
    %62 = math.exp %61 : vector<8x8xf32>
    %c1_36 = arith.constant 1 : index
    %c0_37 = arith.constant 0 : index
    %c0_38 = arith.constant 0 : index
    %63 = vector.load %arg8[%c1_36, %c0_37, %c0_38] : memref<4x8x1xf32, #tpu.memory_space<vmem>>, vector<1x8x1xf32>
    %64 = vector.shape_cast %63 : vector<1x8x1xf32> to vector<8x1xf32>
    %65 = arith.mulf %59, %64 : vector<8x1xf32>
    %cst_39 = arith.constant dense<0.000000e+00> : vector<8xf32>
    %66 = vector.multi_reduction <add>, %62, %cst_39 [1] : vector<8x8xf32> to vector<8xf32>
    %67 = vector.shape_cast %66 : vector<8xf32> to vector<8x1xf32>
    %68 = arith.addf %65, %67 : vector<8x1xf32>
    %c1_40 = arith.constant 1 : index
    %c0_41 = arith.constant 0 : index
    %c0_42 = arith.constant 0 : index
    %69 = vector.load %arg8[%c1_40, %c0_41, %c0_42] : memref<4x8x1xf32, #tpu.memory_space<vmem>>, vector<1x8x1xf32>
    %70 = vector.shape_cast %69 : vector<1x8x1xf32> to vector<8x1xf32>
    %71 = vector.shape_cast %68 : vector<8x1xf32> to vector<1x8x1xf32>
    tpu.vector_store %arg8[%c1_40, %c0_41, %c0_42], %71 {strides = array<i32>} : memref<4x8x1xf32, #tpu.memory_space<vmem>>, vector<1x8x1xf32>,
    %72 = arith.truncf %62 : vector<8x8xf32> to vector<8x8xbf16>
    %cst_43 = arith.constant dense<0.000000e+00> : vector<8x8xf32>
    %73 = tpu.matmul %72, %51, %cst_43 {dimension_numbers = #tpu.dot_dimension_numbers<[1], [0], [0], [1], [0, 0, 1, 1], [], []>} : vector<8x8xbf16>, vector<8x8xbf16>, vector<8x8xf32> -> vector<8x8xf32>
    %c1_44 = arith.constant 1 : index
    %c0_45 = arith.constant 0 : index
    %c0_46 = arith.constant 0 : index
    %74 = vector.load %arg9[%c1_44, %c0_45, %c0_46] : memref<4x8x8xf32, #tpu.memory_space<vmem>>, vector<1x8x8xf32>
    %75 = vector.shape_cast %74 : vector<1x8x8xf32> to vector<8x8xf32>
    %76 = vector.broadcast %59 : vector<8x1xf32> to vector<8x8xf32>
    %77 = arith.mulf %76, %75 : vector<8x8xf32>
    %78 = arith.addf %77, %73 : vector<8x8xf32>
    %c1_47 = arith.constant 1 : index
    %c0_48 = arith.constant 0 : index
    %c0_49 = arith.constant 0 : index
    %79 = vector.load %arg9[%c1_47, %c0_48, %c0_49] : memref<4x8x8xf32, #tpu.memory_space<vmem>>, vector<1x8x8xf32>
    %80 = vector.shape_cast %79 : vector<1x8x8xf32> to vector<8x8xf32>
    %81 = vector.shape_cast %78 : vector<8x8xf32> to vector<1x8x8xf32>
    tpu.vector_store %arg9[%c1_47, %c0_48, %c0_49], %81 {strides = array<i32>} : memref<4x8x8xf32, #tpu.memory_space<vmem>>, vector<1x8x8xf32>,
    %c1_50 = arith.constant 1 : index
    %c0_51 = arith.constant 0 : index
    %c0_52 = arith.constant 0 : index
    %82 = vector.load %arg7[%c1_50, %c0_51, %c0_52] : memref<4x8x1xf32, #tpu.memory_space<vmem>>, vector<1x8x1xf32>
    %83 = vector.shape_cast %82 : vector<1x8x1xf32> to vector<8x1xf32>
    %84 = vector.shape_cast %57 : vector<8x1xf32> to vector<1x8x1xf32>
    tpu.vector_store %arg7[%c1_50, %c0_51, %c0_52], %84 {strides = array<i32>} : memref<4x8x1xf32, #tpu.memory_space<vmem>>, vector<1x8x1xf32>,
    %85 = vector.extract_strided_slice %4 {offsets = [0, 16], sizes = [8, 8], strides = [1, 1]} : vector<8x32xbf16> to vector<8x8xbf16>
    %cst_53 = arith.constant 3.535160e-01 : bf16
    %86 = vector.broadcast %cst_53 : bf16 to vector<8x8xbf16>
    %87 = arith.mulf %85, %86 : vector<8x8xbf16>
    %88 = vector.extract_strided_slice %6 {offsets = [0, 16], sizes = [8, 8], strides = [1, 1]} : vector<8x32xbf16> to vector<8x8xbf16>
    %89 = vector.extract_strided_slice %8 {offsets = [0, 16], sizes = [8, 8], strides = [1, 1]} : vector<8x32xbf16> to vector<8x8xbf16>
    %cst_54 = arith.constant dense<0.000000e+00> : vector<8x8xf32>
    %90 = tpu.matmul %87, %88, %cst_54 {dimension_numbers = #tpu.dot_dimension_numbers<[1], [1], [0], [0], [0, 0, 1, 0], [], []>} : vector<8x8xbf16>, vector<8x8xbf16>, vector<8x8xf32> -> vector<8x8xf32>
    %c2 = arith.constant 2 : index
    %c0_55 = arith.constant 0 : index
    %c0_56 = arith.constant 0 : index
    %91 = vector.load %arg7[%c2, %c0_55, %c0_56] : memref<4x8x1xf32, #tpu.memory_space<vmem>>, vector<1x8x1xf32>
    %92 = vector.shape_cast %91 : vector<1x8x1xf32> to vector<8x1xf32>
    %cst_57 = arith.constant dense<0xFF800000> : vector<8xf32>
    %93 = vector.multi_reduction <maximumf>, %90, %cst_57 [1] : vector<8x8xf32> to vector<8xf32>
    %94 = vector.shape_cast %93 : vector<8xf32> to vector<8x1xf32>
    %95 = arith.maximumf %92, %94 : vector<8x1xf32>
    %96 = arith.subf %92, %95 : vector<8x1xf32>
    %97 = math.exp %96 : vector<8x1xf32>
    %98 = vector.broadcast %95 : vector<8x1xf32> to vector<8x8xf32>
    %99 = arith.subf %90, %98 : vector<8x8xf32>
    %100 = math.exp %99 : vector<8x8xf32>
    %c2_58 = arith.constant 2 : index
    %c0_59 = arith.constant 0 : index
    %c0_60 = arith.constant 0 : index
    %101 = vector.load %arg8[%c2_58, %c0_59, %c0_60] : memref<4x8x1xf32, #tpu.memory_space<vmem>>, vector<1x8x1xf32>
    %102 = vector.shape_cast %101 : vector<1x8x1xf32> to vector<8x1xf32>
    %103 = arith.mulf %97, %102 : vector<8x1xf32>
    %cst_61 = arith.constant dense<0.000000e+00> : vector<8xf32>
    %104 = vector.multi_reduction <add>, %100, %cst_61 [1] : vector<8x8xf32> to vector<8xf32>
    %105 = vector.shape_cast %104 : vector<8xf32> to vector<8x1xf32>
    %106 = arith.addf %103, %105 : vector<8x1xf32>
    %c2_62 = arith.constant 2 : index
    %c0_63 = arith.constant 0 : index
    %c0_64 = arith.constant 0 : index
    %107 = vector.load %arg8[%c2_62, %c0_63, %c0_64] : memref<4x8x1xf32, #tpu.memory_space<vmem>>, vector<1x8x1xf32>
    %108 = vector.shape_cast %107 : vector<1x8x1xf32> to vector<8x1xf32>
    %109 = vector.shape_cast %106 : vector<8x1xf32> to vector<1x8x1xf32>
    tpu.vector_store %arg8[%c2_62, %c0_63, %c0_64], %109 {strides = array<i32>} : memref<4x8x1xf32, #tpu.memory_space<vmem>>, vector<1x8x1xf32>,
    %110 = arith.truncf %100 : vector<8x8xf32> to vector<8x8xbf16>
    %cst_65 = arith.constant dense<0.000000e+00> : vector<8x8xf32>
    %111 = tpu.matmul %110, %89, %cst_65 {dimension_numbers = #tpu.dot_dimension_numbers<[1], [0], [0], [1], [0, 0, 1, 1], [], []>} : vector<8x8xbf16>, vector<8x8xbf16>, vector<8x8xf32> -> vector<8x8xf32>
    %c2_66 = arith.constant 2 : index
    %c0_67 = arith.constant 0 : index
    %c0_68 = arith.constant 0 : index
    %112 = vector.load %arg9[%c2_66, %c0_67, %c0_68] : memref<4x8x8xf32, #tpu.memory_space<vmem>>, vector<1x8x8xf32>
    %113 = vector.shape_cast %112 : vector<1x8x8xf32> to vector<8x8xf32>
    %114 = vector.broadcast %97 : vector<8x1xf32> to vector<8x8xf32>
    %115 = arith.mulf %114, %113 : vector<8x8xf32>
    %116 = arith.addf %115, %111 : vector<8x8xf32>
    %c2_69 = arith.constant 2 : index
    %c0_70 = arith.constant 0 : index
    %c0_71 = arith.constant 0 : index
    %117 = vector.load %arg9[%c2_69, %c0_70, %c0_71] : memref<4x8x8xf32, #tpu.memory_space<vmem>>, vector<1x8x8xf32>
    %118 = vector.shape_cast %117 : vector<1x8x8xf32> to vector<8x8xf32>
    %119 = vector.shape_cast %116 : vector<8x8xf32> to vector<1x8x8xf32>
    tpu.vector_store %arg9[%c2_69, %c0_70, %c0_71], %119 {strides = array<i32>} : memref<4x8x8xf32, #tpu.memory_space<vmem>>, vector<1x8x8xf32>,
    %c2_72 = arith.constant 2 : index
    %c0_73 = arith.constant 0 : index
    %c0_74 = arith.constant 0 : index
    %120 = vector.load %arg7[%c2_72, %c0_73, %c0_74] : memref<4x8x1xf32, #tpu.memory_space<vmem>>, vector<1x8x1xf32>
    %121 = vector.shape_cast %120 : vector<1x8x1xf32> to vector<8x1xf32>
    %122 = vector.shape_cast %95 : vector<8x1xf32> to vector<1x8x1xf32>
    tpu.vector_store %arg7[%c2_72, %c0_73, %c0_74], %122 {strides = array<i32>} : memref<4x8x1xf32, #tpu.memory_space<vmem>>, vector<1x8x1xf32>,
    %123 = vector.extract_strided_slice %4 {offsets = [0, 24], sizes = [8, 8], strides = [1, 1]} : vector<8x32xbf16> to vector<8x8xbf16>
    %cst_75 = arith.constant 3.535160e-01 : bf16
    %124 = vector.broadcast %cst_75 : bf16 to vector<8x8xbf16>
    %125 = arith.mulf %123, %124 : vector<8x8xbf16>
    %126 = vector.extract_strided_slice %6 {offsets = [0, 24], sizes = [8, 8], strides = [1, 1]} : vector<8x32xbf16> to vector<8x8xbf16>
    %127 = vector.extract_strided_slice %8 {offsets = [0, 24], sizes = [8, 8], strides = [1, 1]} : vector<8x32xbf16> to vector<8x8xbf16>
    %cst_76 = arith.constant dense<0.000000e+00> : vector<8x8xf32>
    %128 = tpu.matmul %125, %126, %cst_76 {dimension_numbers = #tpu.dot_dimension_numbers<[1], [1], [0], [0], [0, 0, 1, 0], [], []>} : vector<8x8xbf16>, vector<8x8xbf16>, vector<8x8xf32> -> vector<8x8xf32>
    %c3 = arith.constant 3 : index
    %c0_77 = arith.constant 0 : index
    %c0_78 = arith.constant 0 : index
    %129 = vector.load %arg7[%c3, %c0_77, %c0_78] : memref<4x8x1xf32, #tpu.memory_space<vmem>>, vector<1x8x1xf32>
    %130 = vector.shape_cast %129 : vector<1x8x1xf32> to vector<8x1xf32>
    %cst_79 = arith.constant dense<0xFF800000> : vector<8xf32>
    %131 = vector.multi_reduction <maximumf>, %128, %cst_79 [1] : vector<8x8xf32> to vector<8xf32>
    %132 = vector.shape_cast %131 : vector<8xf32> to vector<8x1xf32>
    %133 = arith.maximumf %130, %132 : vector<8x1xf32>
    %134 = arith.subf %130, %133 : vector<8x1xf32>
    %135 = math.exp %134 : vector<8x1xf32>
    %136 = vector.broadcast %133 : vector<8x1xf32> to vector<8x8xf32>
    %137 = arith.subf %128, %136 : vector<8x8xf32>
    %138 = math.exp %137 : vector<8x8xf32>
    %c3_80 = arith.constant 3 : index
    %c0_81 = arith.constant 0 : index
    %c0_82 = arith.constant 0 : index
    %139 = vector.load %arg8[%c3_80, %c0_81, %c0_82] : memref<4x8x1xf32, #tpu.memory_space<vmem>>, vector<1x8x1xf32>
    %140 = vector.shape_cast %139 : vector<1x8x1xf32> to vector<8x1xf32>
    %141 = arith.mulf %135, %140 : vector<8x1xf32>
    %cst_83 = arith.constant dense<0.000000e+00> : vector<8xf32>
    %142 = vector.multi_reduction <add>, %138, %cst_83 [1] : vector<8x8xf32> to vector<8xf32>
    %143 = vector.shape_cast %142 : vector<8xf32> to vector<8x1xf32>
    %144 = arith.addf %141, %143 : vector<8x1xf32>
    %c3_84 = arith.constant 3 : index
    %c0_85 = arith.constant 0 : index
    %c0_86 = arith.constant 0 : index
    %145 = vector.load %arg8[%c3_84, %c0_85, %c0_86] : memref<4x8x1xf32, #tpu.memory_space<vmem>>, vector<1x8x1xf32>
    %146 = vector.shape_cast %145 : vector<1x8x1xf32> to vector<8x1xf32>
    %147 = vector.shape_cast %144 : vector<8x1xf32> to vector<1x8x1xf32>
    tpu.vector_store %arg8[%c3_84, %c0_85, %c0_86], %147 {strides = array<i32>} : memref<4x8x1xf32, #tpu.memory_space<vmem>>, vector<1x8x1xf32>,
    %148 = arith.truncf %138 : vector<8x8xf32> to vector<8x8xbf16>
    %cst_87 = arith.constant dense<0.000000e+00> : vector<8x8xf32>
    %149 = tpu.matmul %148, %127, %cst_87 {dimension_numbers = #tpu.dot_dimension_numbers<[1], [0], [0], [1], [0, 0, 1, 1], [], []>} : vector<8x8xbf16>, vector<8x8xbf16>, vector<8x8xf32> -> vector<8x8xf32>
    %c3_88 = arith.constant 3 : index
    %c0_89 = arith.constant 0 : index
    %c0_90 = arith.constant 0 : index
    %150 = vector.load %arg9[%c3_88, %c0_89, %c0_90] : memref<4x8x8xf32, #tpu.memory_space<vmem>>, vector<1x8x8xf32>
    %151 = vector.shape_cast %150 : vector<1x8x8xf32> to vector<8x8xf32>
    %152 = vector.broadcast %135 : vector<8x1xf32> to vector<8x8xf32>
    %153 = arith.mulf %152, %151 : vector<8x8xf32>
    %154 = arith.addf %153, %149 : vector<8x8xf32>
    %c3_91 = arith.constant 3 : index
    %c0_92 = arith.constant 0 : index
    %c0_93 = arith.constant 0 : index
    %155 = vector.load %arg9[%c3_91, %c0_92, %c0_93] : memref<4x8x8xf32, #tpu.memory_space<vmem>>, vector<1x8x8xf32>
    %156 = vector.shape_cast %155 : vector<1x8x8xf32> to vector<8x8xf32>
    %157 = vector.shape_cast %154 : vector<8x8xf32> to vector<1x8x8xf32>
    tpu.vector_store %arg9[%c3_91, %c0_92, %c0_93], %157 {strides = array<i32>} : memref<4x8x8xf32, #tpu.memory_space<vmem>>, vector<1x8x8xf32>,
    %c3_94 = arith.constant 3 : index
    %c0_95 = arith.constant 0 : index
    %c0_96 = arith.constant 0 : index
    %158 = vector.load %arg7[%c3_94, %c0_95, %c0_96] : memref<4x8x1xf32, #tpu.memory_space<vmem>>, vector<1x8x1xf32>
    %159 = vector.shape_cast %158 : vector<1x8x1xf32> to vector<8x1xf32>
    %160 = vector.shape_cast %133 : vector<8x1xf32> to vector<1x8x1xf32>
    tpu.vector_store %arg7[%c3_94, %c0_95, %c0_96], %160 {strides = array<i32>} : memref<4x8x1xf32, #tpu.memory_space<vmem>>, vector<1x8x1xf32>,
    %c0_i32_97 = arith.constant 0 : i32
    %161 = arith.cmpi eq, %arg2, %c0_i32_97 : i32
    %162 = arith.extui %161 : i1 to i32
    %c0_i32_98 = arith.constant 0 : i32
    %163 = arith.cmpi ne, %162, %c0_i32_98 : i32
    scf.if %163 {
      %c0_99 = arith.constant 0 : index
      %c0_100 = arith.constant 0 : index
      %c0_101 = arith.constant 0 : index
      %164 = vector.load %arg8[%c0_99, %c0_100, %c0_101] : memref<4x8x1xf32, #tpu.memory_space<vmem>>, vector<1x8x1xf32>
      %165 = vector.shape_cast %164 : vector<1x8x1xf32> to vector<8x1xf32>
      %166 = tpu.reciprocal %165 {approx = true} : vector<8x1xf32> -> vector<8x1xf32>
      %c0_102 = arith.constant 0 : index
      %c0_103 = arith.constant 0 : index
      %c0_104 = arith.constant 0 : index
      %167 = vector.load %arg9[%c0_102, %c0_103, %c0_104] : memref<4x8x8xf32, #tpu.memory_space<vmem>>, vector<1x8x8xf32>
      %168 = vector.shape_cast %167 : vector<1x8x8xf32> to vector<8x8xf32>
      %169 = vector.broadcast %166 : vector<8x1xf32> to vector<8x8xf32>
      %170 = arith.mulf %168, %169 : vector<8x8xf32>
      %c1_105 = arith.constant 1 : index
      %c0_106 = arith.constant 0 : index
      %c0_107 = arith.constant 0 : index
      %171 = vector.load %arg8[%c1_105, %c0_106, %c0_107] : memref<4x8x1xf32, #tpu.memory_space<vmem>>, vector<1x8x1xf32>
      %172 = vector.shape_cast %171 : vector<1x8x1xf32> to vector<8x1xf32>
      %173 = tpu.reciprocal %172 {approx = true} : vector<8x1xf32> -> vector<8x1xf32>
      %c1_108 = arith.constant 1 : index
      %c0_109 = arith.constant 0 : index
      %c0_110 = arith.constant 0 : index
      %174 = vector.load %arg9[%c1_108, %c0_109, %c0_110] : memref<4x8x8xf32, #tpu.memory_space<vmem>>, vector<1x8x8xf32>
      %175 = vector.shape_cast %174 : vector<1x8x8xf32> to vector<8x8xf32>
      %176 = vector.broadcast %173 : vector<8x1xf32> to vector<8x8xf32>
      %177 = arith.mulf %175, %176 : vector<8x8xf32>
      %c2_111 = arith.constant 2 : index
      %c0_112 = arith.constant 0 : index
      %c0_113 = arith.constant 0 : index
      %178 = vector.load %arg8[%c2_111, %c0_112, %c0_113] : memref<4x8x1xf32, #tpu.memory_space<vmem>>, vector<1x8x1xf32>
      %179 = vector.shape_cast %178 : vector<1x8x1xf32> to vector<8x1xf32>
      %180 = tpu.reciprocal %179 {approx = true} : vector<8x1xf32> -> vector<8x1xf32>
      %c2_114 = arith.constant 2 : index
      %c0_115 = arith.constant 0 : index
      %c0_116 = arith.constant 0 : index
      %181 = vector.load %arg9[%c2_114, %c0_115, %c0_116] : memref<4x8x8xf32, #tpu.memory_space<vmem>>, vector<1x8x8xf32>
      %182 = vector.shape_cast %181 : vector<1x8x8xf32> to vector<8x8xf32>
      %183 = vector.broadcast %180 : vector<8x1xf32> to vector<8x8xf32>
      %184 = arith.mulf %182, %183 : vector<8x8xf32>
      %c3_117 = arith.constant 3 : index
      %c0_118 = arith.constant 0 : index
      %c0_119 = arith.constant 0 : index
      %185 = vector.load %arg8[%c3_117, %c0_118, %c0_119] : memref<4x8x1xf32, #tpu.memory_space<vmem>>, vector<1x8x1xf32>
      %186 = vector.shape_cast %185 : vector<1x8x1xf32> to vector<8x1xf32>
      %187 = tpu.reciprocal %186 {approx = true} : vector<8x1xf32> -> vector<8x1xf32>
      %c3_120 = arith.constant 3 : index
      %c0_121 = arith.constant 0 : index
      %c0_122 = arith.constant 0 : index
      %188 = vector.load %arg9[%c3_120, %c0_121, %c0_122] : memref<4x8x8xf32, #tpu.memory_space<vmem>>, vector<1x8x8xf32>
      %189 = vector.shape_cast %188 : vector<1x8x8xf32> to vector<8x8xf32>
      %190 = vector.broadcast %187 : vector<8x1xf32> to vector<8x8xf32>
      %191 = arith.mulf %189, %190 : vector<8x8xf32>
      %192 = tpu.concatenate %170, %177, %184, %191 in 1 : vector<8x8xf32>, vector<8x8xf32>, vector<8x8xf32>, vector<8x8xf32> -> vector<8x32xf32>
      %193 = arith.truncf %192 : vector<8x32xf32> to vector<8x32xbf16>
      %c0_123 = arith.constant 0 : index
      %c0_124 = arith.constant 0 : index
      %c0_125 = arith.constant 0 : index
      %194 = vector.load %arg6[%c0_123, %c0_124, %c0_125] : memref<1x8x32xbf16, #tpu.memory_space<vmem>>, vector<1x8x32xbf16>
      %195 = vector.shape_cast %194 : vector<1x8x32xbf16> to vector<8x32xbf16>
      %196 = vector.shape_cast %193 : vector<8x32xbf16> to vector<1x8x32xbf16>
      tpu.vector_store %arg6[%c0_123, %c0_124, %c0_125], %196 {strides = array<i32>} : memref<1x8x32xbf16, #tpu.memory_space<vmem>>, vector<1x8x32xbf16>,
    } else {
    }
    return
  }
  func.func @transform_0(%arg0: i32, %arg1: i32, %arg2: i32) -> (i32, i32, i32) {
    %c0_i32 = arith.constant 0 : i32
    %c0_i32_0 = arith.constant 0 : i32
    return %arg0, %arg1, %c0_i32 : i32, i32, i32
  }
  func.func @transform_1(%arg0: i32, %arg1: i32, %arg2: i32) -> (i32, i32, i32) {
    %c0_i32 = arith.constant 0 : i32
    %c0_i32_0 = arith.constant 0 : i32
    return %arg0, %arg2, %c0_i32 : i32, i32, i32
  }
  func.func @transform_2(%arg0: i32, %arg1: i32, %arg2: i32) -> (i32, i32, i32) {
    %c0_i32 = arith.constant 0 : i32
    %c0_i32_0 = arith.constant 0 : i32
    return %arg0, %arg2, %c0_i32 : i32, i32, i32
  }
  func.func @transform_3(%arg0: i32, %arg1: i32, %arg2: i32) -> (i32, i32, i32) {
    %c0_i32 = arith.constant 0 : i32
    %c0_i32_0 = arith.constant 0 : i32
    return %arg0, %arg1, %c0_i32 : i32, i32, i32
  }
}

</mosaic_0001>

<bundles_post_ra>
// kernel: a_call__.7
= control target key start
LH: loop header
LB: loop body
LE: loop exit
PB: predicated region body
PF: predicated region fallthrough
CT: control target
= control target key end

     0   :  { %vm19_vm0 = vcmask 261120   ;;  %v150_v0 = vmov 0.0   ;;  %vm151_vm1 = vmmov 0   ;;  %vm118_vm2 = vcmask 257024   ;;  %s195_s1 = inlined_call_operand.vmem [shape: bf16[32,32], index: 1, kind: input, shape index: {}]   ;;  %s196_s0 = inlined_call_operand.vmem [shape: bf16[16,32], index: 0, kind: input, shape index: {}]   ;;  %s197_s2 = inlined_call_operand.vmem [shape: f32[1,32], index: 2, kind: input, shape index: {}]   ;;  %s198_s3 = inlined_call_operand.vmem [shape: bf16[16,32], index: 3, kind: output, shape index: {}]  }
   0x1   :  { %137 = vmatprep.subr.bf16.mxu0 %v150_v0  ;;  %v147_v1 = vld [vmem:[%s195_s1] sm:$0xff]   ;;  %141 = vmatprep.mubr.msk.bf16.mxu0 %vm151_vm1, %v150_v0  ;;  %20 = vst.msk [vmem:[#allocation2] sm:$0xff] %vm19_vm0, %v150_v0  ;;  %21 = vst.msk [vmem:[#allocation2 + $0x8] sm:$0xff] %vm19_vm0, %v150_v0  ;;  %v148_v2 = vld [vmem:[%s195_s1 + $0x8] sm:$0xff]  }
   0x2   :  { %138 = vmatpush3.bf16.msra.mxu0 %v147_v1  ;;  %v149_v3 = vld [vmem:[%s196_s0] sm:$0xff]  }
   0x3   :  { %139 = vmatprep.subr.bf16.mxu0 %v150_v0  ;;  %v129_v12 = vld [vmem:[%s197_s2] ss:$0 sm:$0xff] }
   0x6   :  { %140 = vmatpush3.bf16.msra.mxu0 %v148_v2 }
   0x8   :  { %v22_v4 = vld [vmem:[#allocation2] sm:$0xff]  ;;  %v23_v6 = vld [vmem:[#allocation2 + $0x8] sm:$0xff] }
   0x9   :  { %142 = vmatmul.mubr.msk.bf16.vlgmr.msra.gmra.mrb[0].mxu0 %vm19_vm0, %v149_v3 }
  0xdc   :  { %v85_v5 = vpop.f32.mrb[0].mxu0 }
  0xdd   :  { %v92_v7 = vadd.f32 %v85_v5, %v22_v4  ;;  %v143_v8 = vpop.f32.mrb[1].mxu0 }
  0xde   :  { %v88_v9 = vpop.f32.mrb[2].mxu0 }
  0xdf   :  { %94 = vst.msk [vmem:[#allocation2] sm:$0xff] %vm19_vm0, %v92_v7  ;;  %v93_v10 = vadd.f32 %v88_v9, %v23_v6  ;;  %v144_v11 = vpop.f32.mrb[3].mxu0 }
  0xe1   :  { %95 = vst.msk [vmem:[#allocation2 + $0x8] sm:$0xff] %vm19_vm0, %v93_v10 }
  0xe6   :  { %v99_v13 = vld [vmem:[#allocation2] sm:$0xff] }
  0xe7   :  { %v108_v14 = vadd.f32 %v129_v12, %v99_v13 }
  0xe8   :  { %v100_v15 = vld [vmem:[#allocation2 + $0x8] sm:$0xff] }
  0xe9   :  { %v132_v16 = vpack.c.bf16 %v108_v14, %v108_v14  ;;  %v109_v17 = vadd.f32 %v129_v12, %v100_v15 }
  0xeb   :  { %119 = vst.msk [vmem:[%s198_s3] sm:$0xf] %vm118_vm2, %v132_v16  ;;  %v133_v18 = vpack.c.bf16 %v109_v17, %v109_v17 }
  0xed   :  { %120 = vst.msk [vmem:[%s198_s3 + $0x4] sm:$0xf] %vm118_vm2, %v133_v18 }

// kernel: a_call__.9
= control target key start
LH: loop header
LB: loop body
LE: loop exit
PB: predicated region body
PF: predicated region fallthrough
CT: control target
= control target key end

     0   :  { %vm19_vm0 = vcmask 261120   ;;  %v137_v0 = vmov 0.0   ;;  %vm138_vm1 = vmmov 0   ;;  %s184_s1 = inlined_call_operand.vmem [shape: bf16[32,32], index: 1, kind: input, shape index: {}]   ;;  %s185_s0 = inlined_call_operand.vmem [shape: bf16[16,32], index: 0, kind: input, shape index: {}]   ;;  %s186_s2 = inlined_call_operand.vmem [shape: f32[1,32], index: 2, kind: input, shape index: {}]   ;;  %s187_s3 = inlined_call_operand.vmem [shape: f32[16,32], index: 3, kind: output, shape index: {}]  }
   0x1   :  { %124 = vmatprep.subr.bf16.mxu0 %v137_v0  ;;  %v134_v1 = vld [vmem:[%s184_s1] sm:$0xff]   ;;  %128 = vmatprep.mubr.msk.bf16.mxu0 %vm138_vm1, %v137_v0  ;;  %20 = vst.msk [vmem:[#allocation2] sm:$0xff] %vm19_vm0, %v137_v0  ;;  %21 = vst.msk [vmem:[#allocation2 + $0x8] sm:$0xff] %vm19_vm0, %v137_v0  ;;  %v135_v2 = vld [vmem:[%s184_s1 + $0x8] sm:$0xff]  }
   0x2   :  { %125 = vmatpush3.bf16.msra.mxu0 %v134_v1  ;;  %v136_v3 = vld [vmem:[%s185_s0] sm:$0xff]  }
   0x3   :  { %126 = vmatprep.subr.bf16.mxu0 %v137_v0  ;;  %v120_v12 = vld [vmem:[%s186_s2] ss:$0 sm:$0xff] }
   0x6   :  { %127 = vmatpush3.bf16.msra.mxu0 %v135_v2 }
   0x8   :  { %v22_v4 = vld [vmem:[#allocation2] sm:$0xff]  ;;  %v23_v6 = vld [vmem:[#allocation2 + $0x8] sm:$0xff] }
   0x9   :  { %129 = vmatmul.mubr.msk.bf16.vlgmr.msra.gmra.mrb[0].mxu0 %vm19_vm0, %v136_v3 }
  0xdc   :  { %v85_v5 = vpop.f32.mrb[0].mxu0 }
  0xdd   :  { %v92_v7 = vadd.f32 %v85_v5, %v22_v4  ;;  %v130_v8 = vpop.f32.mrb[1].mxu0 }
  0xde   :  { %v88_v9 = vpop.f32.mrb[2].mxu0 }
  0xdf   :  { %94 = vst.msk [vmem:[#allocation2] sm:$0xff] %vm19_vm0, %v92_v7  ;;  %v93_v10 = vadd.f32 %v88_v9, %v23_v6  ;;  %v131_v11 = vpop.f32.mrb[3].mxu0 }
  0xe1   :  { %95 = vst.msk [vmem:[#allocation2 + $0x8] sm:$0xff] %vm19_vm0, %v93_v10 }
  0xe6   :  { %v99_v13 = vld [vmem:[#allocation2] sm:$0xff] }
  0xe7   :  { %v108_v14 = vadd.f32 %v120_v12, %v99_v13 }
  0xe8   :  { %v100_v15 = vld [vmem:[#allocation2 + $0x8] sm:$0xff] }
  0xe9   :  { %110 = vst.msk [vmem:[%s187_s3] sm:$0xff] %vm19_vm0, %v108_v14  ;;  %v109_v16 = vadd.f32 %v120_v12, %v100_v15 }
  0xeb   :  { %111 = vst.msk [vmem:[%s187_s3 + $0x8] sm:$0xff] %vm19_vm0, %v109_v16 }

// kernel: a_call__.8
= control target key start
LH: loop header
LB: loop body
LE: loop exit
PB: predicated region body
PF: predicated region fallthrough
CT: control target
= control target key end

     0   :  { %s1195_s12 = smov 0   ;;  %s1197_s13 = smov 0   ;;  %s1355_s0 = inlined_call_operand.vmem [shape: bf16[2,8,32], index: 0, kind: input, shape index: {}]   ;;  %s1356_s1 = inlined_call_operand.vmem [shape: bf16[2,8,32], index: 1, kind: input, shape index: {}]   ;;  %s1357_s2 = inlined_call_operand.vmem [shape: bf16[2,8,32], index: 2, kind: input, shape index: {}]   ;;  %s1358_s3 = inlined_call_operand.vmem [shape: bf16[2,8,32], index: 3, kind: output, shape index: {}]  }
   0x1   :  { %s1199_s14 = smov 0  }
   0x2 LB: > { %s32_s15 = sadd.s32 1, %s1159_s13  ;;  %p997_p0 = scmp.ge.s32.totalorder %s1163_s14, 1  ;;  %s1163_s14 = sphi %s1199_s14, %s13_s14   ;;  %s1159_s13 = sphi %s1197_s13, %s1360_s13   ;;  %s1155_s12 = sphi %s1195_s12, %s1359_s12  }
   0x3   : > { %p34_p1 = scmp.ge.s32.totalorder %s32_s15, 2  ;;  %p190_p2 = scmp.lt.s32.totalorder %s1163_s14, 3 }
   0x5   : > { %s1362_s15 = smov (%p34_p1, %s32_s15), 0  ;;  %p191_p3 = pnand %p997_p0, %p190_p2 }
   0x6   : > { %p232_p4 = scmp.lt.s32.totalorder (!%p191_p3), %s1155_s12, 1  ;;  %vm275_vm0 = vcmask (!%p191_p3), 64512   ;;  %v1165_v0 = vmov (!%p191_p3), 0.0   ;;  %vm1166_vm1 = vmmov (!%p191_p3), 0   ;;  %vm266_vm2 = vcmask (!%p191_p3), 7168   ;;  %s1169_s23 = smov (!%p191_p3), 120  }
   0x7   : > { %194 = sbr.rel (%p191_p3) target bundleno = 1465 (0x5b9), region = 32  ;;  %1031 = vmatprep.subr.bf16.mxu0 (!%p191_p3), %v1165_v0  ;;  %276 = vst.msk [vmem:[#allocation4] sm:$0xff] (!%p191_p3), %vm275_vm0, %v1165_v0  ;;  %277 = vst.msk [vmem:[#allocation4 + $0x8] sm:$0xff] (!%p191_p3), %vm275_vm0, %v1165_v0  ;;  %1033 = vmatprep.mubr.msk.bf16.mxu0 (!%p191_p3), %vm1166_vm1, %v1165_v0  ;;  %v1167_v5 = vmov (!%p191_p3), -inf   ;;  %v1168_v11 = vmov (!%p191_p3), 0   ;;  %s1170_s24 = smov (!%p191_p3), 112  }
   0x8   : > { %278 = vst.msk [vmem:[#allocation4 + $0x10] sm:$0xff] (!%p191_p3), %vm275_vm0, %v1165_v0  ;;  %279 = vst.msk [vmem:[#allocation4 + $0x18] sm:$0xff] (!%p191_p3), %vm275_vm0, %v1165_v0  ;;  %1037 = vmatprep.subr.bf16.mxu1 (!%p191_p3), %v1165_v0  ;;  %1039 = vmatprep.mubr.msk.bf16.mxu1 (!%p191_p3), %vm1166_vm1, %v1165_v0  ;;  %s1171_s25 = smov (!%p191_p3), 104   ;;  %vm359_vm3 = vcmask (!%p191_p3), 1043456   ;;  %s1172_s29 = smov (!%p191_p3), 8   ;;  %vm879_vm4 = vcmask (!%p191_p3), 130048  }
   0x9   : > { %267 = vst.msk [vmem:[#allocation2] sm:$0xff] (!%p191_p3), %vm266_vm2, %v1167_v5  ;;  %268 = vst.msk [vmem:[#allocation2 + $0x8] sm:$0xff] (!%p191_p3), %vm266_vm2, %v1167_v5  ;;  %1113 = vset.pattern.permute.xlu0 (!%p191_p3), %v1168_v11  ;;  %1114 = vset.pattern.permute.xlu1 (!%p191_p3), %v1168_v11  ;;  %s1173_s30 = smov (!%p191_p3), 16   ;;  %s1174_s4 = smov (!%p191_p3), 24   ;;  %vm881_vm5 = vcmask (!%p191_p3), 195584   ;;  %vm884_vm6 = vcmask (!%p191_p3), 257024  }
   0xa   : > { %269 = vst.msk [vmem:[#allocation2 + $0x10] sm:$0xff] (!%p191_p3), %vm266_vm2, %v1167_v5  ;;  %270 = vst.msk [vmem:[#allocation2 + $0x18] sm:$0xff] (!%p191_p3), %vm266_vm2, %v1167_v5 }
   0xb   : > { %271 = vst.msk [vmem:[#allocation3] sm:$0xff] (!%p191_p3), %vm266_vm2, %v1165_v0  ;;  %272 = vst.msk [vmem:[#allocation3 + $0x8] sm:$0xff] (!%p191_p3), %vm266_vm2, %v1165_v0 }
   0xc   : > { %273 = vst.msk [vmem:[#allocation3 + $0x10] sm:$0xff] (!%p191_p3), %vm266_vm2, %v1165_v0  ;;  %274 = vst.msk [vmem:[#allocation3 + $0x18] sm:$0xff] (!%p191_p3), %vm266_vm2, %v1165_v0 }
   0xe   : > { %s1364_s12 = smov (!%p232_p4, %s1155_s12), 1 }
   0xf   : > { %s1227_s16 = sshll.u32 %s1364_s12, 2 }
  0x10   : > { %s245_s19 = scalar_lea.vmem %s1356_s1, %s1227_s16  ;;  %s238_s22 = scalar_lea.vmem %s1355_s0, %s1227_s16  ;;  %v1261_v14 = vld [vmem:[#allocation2] sm:$0xff]  ;;  %v470_v53 = vld [vmem:[#allocation2 + $0x8] sm:$0xff] }
  0x11   : > { %v281_v1 = vld [vmem:[%s245_s19] sm:$0xf]  ;;  %s252_s28 = scalar_lea.vmem %s1357_s2, %s1227_s16  ;;  %v608_v57 = vld [vmem:[#allocation2 + $0x10] sm:$0xff]  ;;  %v743_v61 = vld [vmem:[#allocation2 + $0x18] sm:$0xff]  ;;  %s259_s7 = scalar_lea.vmem %s1358_s3, %s1227_s16 }
  0x12   : > { %v289_v2 = vsel %vm275_vm0, %v281_v1, 0  ;;  %v280_v3 = vld [vmem:[%s238_s22] sm:$0xf]  ;;  %v1005_v12 = vcombine.low %v281_v1, %v281_v1 }
  0x13   : > { %1032 = vmatpush3.bf16.xpose.msra.mxu0 %v289_v2  ;;  %v283_v4 = vmul.bf16 1052065461, %v280_v3  ;;  %v1275_v18 = vld [vmem:[%s252_s28] sm:$0xf] }
  0x14   : > { %1049 = vmatprep.subr.bf16.mxu0 %v1165_v0  ;;  %421 = vrot.lane.b32.xlu1 %v1005_v12, %s1169_s23  ;;  %v361_v19 = vsel %vm359_vm3, %v1275_v18, 0  ;;  %v1007_v1 = vcombine.low %v1275_v18, %v1275_v18 }
  0x15   : > { %v1004_v13 = vcombine.low %v283_v4, %v283_v4  ;;  %1038 = vmatpush3.bf16.msra.mxu1 %v361_v19 }
  0x16   : > { %1043 = vmatprep.subr.bf16.mxu1 %v1165_v0 }
  0x18   : > { %416 = vrot.lane.b32.xlu1 %v1004_v13, %s1169_s23 }
  0x1a   : > { %1034 = vmatmul.mubr.msk.bf16.vlgmr.msra.gmra.mrb[0].mxu0 %vm275_vm0, %v283_v4 }
  0x1b   : > { %1051 = vmatprep.mubr.msk.bf16.mxu0 %vm1166_vm1, %v1165_v0 }
  0x1c   : > { %559 = vrot.lane.b32.xlu1 %v1005_v12, %s1170_s24 }
  0x20   : > { %557 = vrot.lane.b32.xlu1 %v1004_v13, %s1170_s24 }
  0x24   : > { %694 = vrot.lane.b32.xlu1 %v1005_v12, %s1171_s25 }
  0x28   : > { %692 = vrot.lane.b32.xlu1 %v1004_v13, %s1171_s25 }
  0x86   : > { %v422_v23 = vpop.permute.xlu1 %421 }
  0x87   : > { %v427_v26 = vsel %vm275_vm0, %v422_v23, 0 }
  0x8a   : > { %v417_v24 = vpop.permute.xlu1 %416 }
  0x8e   : > { %v560_v28 = vpop.permute.xlu1 %559 }
  0x8f   : > { %v565_v30 = vsel %vm275_vm0, %v560_v28, 0 }
  0x92   : > { %v558_v29 = vpop.permute.xlu1 %557 }
  0x96   : > { %v695_v31 = vpop.permute.xlu1 %694 }
  0x97   : > { %v700_v32 = vsel %vm275_vm0, %v695_v31, 0 }
  0x9a   : > { %v693_v33 = vpop.permute.xlu1 %692 }
  0xed   : > { %v325_v6 = vpop.f32.mrb[0].mxu0 }
  0xee   : > { %v1035_v7 = vpop.f32.mrb[1].mxu0  ;;  %v332_v8 = vsel %vm275_vm0, %v325_v6, -inf }
  0xef   : > { %333 = vmax.xlane.f32.xlu0 %v332_v8  ;;  %v328_v9 = vpop.f32.mrb[2].mxu0 }
  0xf0   : > { %v1036_v10 = vpop.f32.mrb[3].mxu0 }
 0x17c   : > { %v334_v15 = vpop.xlane.xlu0 %333 }
 0x17d   : > { %v1264_v16 = vmax.f32 %v1261_v14, %v334_v15 }
 0x17f   : > { %v336_v17 = vsub.f32 %v1261_v14, %v1264_v16  ;;  %412 = vst.msk [vmem:[#allocation2] sm:$0xff] %vm266_vm2, %v1264_v16  ;;  %341 = vperm.xlu0 %1113, %v1264_v16  }
 0x1fe   : > { %v342_v20 = vpop.permute.xlu0 %341 }
 0x1ff   : > { %v344_v21 = vsub.f32 %v325_v6, %v342_v20 }
 0x201   : > { %v345_v22 = vmul.f32 1.442695, %v344_v21 }
 0x203   : > { %1117 = vpow2.f32 %v345_v22 }
 0x20d   : > { %v1280_v25 = vpop.eup %1117 }
 0x20e   : > { %v355_v27 = vpack.c.bf16 %v1280_v25, %v1280_v25  ;;  %v349_v18 = vsel %vm275_vm0, %v1280_v25, 0.0 }
 0x210   : > { %1040 = vmatmul.mubr.msk.bf16.vlgmr.msra.gmra.mrb[0].mxu1 %vm275_vm0, %v355_v27 }
 0x211   : > { %1044 = vmatpush3.bf16.xpose.msra.mxu1 %v427_v26  ;;  %1045 = vmatprep.mubr.msk.bf16.mxu1 %vm1166_vm1, %v1165_v0 }
 0x212   : > { %1055 = vmatprep.subr.bf16.mxu1 %v1165_v0 }
 0x218   : > { %1046 = vmatmul.mubr.msk.bf16.vlgmr.msra.gmra.mrb[4].mxu1 %vm275_vm0, %v417_v24 }
 0x219   : > { %1056 = vmatpush3.bf16.xpose.msra.mxu1 %v565_v30  ;;  %1057 = vmatprep.mubr.msk.bf16.mxu1 %vm1166_vm1, %v1165_v0 }
 0x21a   : > { %1067 = vmatprep.subr.bf16.mxu1 %v1165_v0 }
 0x220   : > { %1058 = vmatmul.mubr.msk.bf16.vlgmr.msra.gmra.mrb[8].mxu1 %vm275_vm0, %v558_v29 }
 0x221   : > { %1068 = vmatpush3.bf16.xpose.msra.mxu1 %v700_v32  ;;  %1069 = vmatprep.mubr.msk.bf16.mxu1 %vm1166_vm1, %v1165_v0 }
 0x228   : > { %1070 = vmatmul.mubr.msk.bf16.vlgmr.msra.gmra.mrb[12].mxu1 %vm275_vm0, %v693_v33 }
 0x2e3   : > { %v1299_v34 = vpop.f32.mrb[0].mxu1 }
 0x2e4   : > { %v1041_v35 = vpop.f32.mrb[1].mxu1 }
 0x2e5   : > { %v400_v36 = vpop.f32.mrb[2].mxu1  ;;  %v337_v35 = vmul.f32 1.442695, %v336_v17  ;;  %v625_v17 = vld [vmem:[#allocation3 + $0x10] sm:$0xff] }
 0x2e6   : > { %v1042_v37 = vpop.f32.mrb[3].mxu1 }
 0x2eb   : > { %v463_v38 = vpop.f32.mrb[4].mxu1 }
 0x2ec   : > { %v1047_v39 = vpop.f32.mrb[5].mxu1  ;;  %v471_v40 = vsel %vm275_vm0, %v463_v38, -inf }
 0x2ed   : > { %472 = vmax.xlane.f32.xlu1 %v471_v40  ;;  %v466_v41 = vpop.f32.mrb[6].mxu1  ;;  %v487_v40 = vld [vmem:[#allocation3 + $0x8] sm:$0xff] }
 0x2ee   : > { %v1048_v42 = vpop.f32.mrb[7].mxu1 }
 0x2ef   : > { %v347_v42 = vld [vmem:[#allocation3] sm:$0xff] }
 0x2f3   : > { %v601_v43 = vpop.f32.mrb[8].mxu1 }
 0x2f4   : > { %v1059_v44 = vpop.f32.mrb[9].mxu1  ;;  %v609_v45 = vsel %vm275_vm0, %v601_v43, -inf }
 0x2f5   : > { %610 = vmax.xlane.f32.xlu0 %v609_v45  ;;  %v604_v46 = vpop.f32.mrb[10].mxu1 }
 0x2f6   : > { %v1060_v47 = vpop.f32.mrb[11].mxu1 }
 0x2fb   : > { %v736_v48 = vpop.f32.mrb[12].mxu1 }
 0x2fc   : > { %v1071_v49 = vpop.f32.mrb[13].mxu1  ;;  %v744_v50 = vsel %vm275_vm0, %v736_v48, -inf }
 0x2fd   : > { %745 = vmax.xlane.f32.xlu1 %v744_v50  ;;  %v739_v51 = vpop.f32.mrb[14].mxu1  ;;  %v760_v49 = vld [vmem:[#allocation3 + $0x18] sm:$0xff] }
 0x2fe   : > { %v1072_v52 = vpop.f32.mrb[15].mxu1 }
 0x37a   : > { %v473_v54 = vpop.xlane.xlu1 %472 }
 0x37b   : > { %v474_v55 = vmax.f32 %v470_v53, %v473_v54 }
 0x37d   : > { %v475_v56 = vsub.f32 %v470_v53, %v474_v55  ;;  %556 = vst.msk [vmem:[#allocation2 + $0x8] sm:$0xff] %vm266_vm2, %v474_v55  ;;  %480 = vperm.xlu1 %1114, %v474_v55  }
 0x37f   : > { %v476_v21 = vmul.f32 1.442695, %v475_v56  ;;  %v403_v56 = vld [vmem:[#allocation4] sm:$0xff] }
 0x382   : > { %v611_v58 = vpop.xlane.xlu0 %610 }
 0x383   : > { %v612_v59 = vmax.f32 %v608_v57, %v611_v58 }
 0x385   : > { %v613_v60 = vsub.f32 %v608_v57, %v612_v59  ;;  %691 = vst.msk [vmem:[#allocation2 + $0x10] sm:$0xff] %vm266_vm2, %v612_v59  ;;  %618 = vperm.xlu0 %1113, %v612_v59  }
 0x387   : > { %v614_v25 = vmul.f32 1.442695, %v613_v60 }
 0x38a   : > { %v746_v62 = vpop.xlane.xlu1 %745 }
 0x38b   : > { %v747_v63 = vmax.f32 %v743_v61, %v746_v62 }
 0x38d   : > { %v748_v2 = vsub.f32 %v743_v61, %v747_v63  ;;  %826 = vst.msk [vmem:[#allocation2 + $0x18] sm:$0xff] %vm266_vm2, %v747_v63  ;;  %753 = vperm.xlu1 %1114, %v747_v63  }
 0x38f   : > { %v749_v37 = vmul.f32 1.442695, %v748_v2 }
 0x391   : > { %498 = vrot.lane.b32.xlu1 %v1007_v1, %s1169_s23 }
 0x395   : > { %633 = vrot.lane.b32.xlu1 %v1007_v1, %s1170_s24 }
 0x399   : > { %768 = vrot.lane.b32.xlu1 %v1007_v1, %s1171_s25  ;;  %v547_v1 = vld [vmem:[#allocation4 + $0x8] sm:$0xff] }
 0x3fc   : > { %v481_v3 = vpop.permute.xlu1 %480 }
 0x3fd   : > { %v483_v4 = vsub.f32 %v463_v38, %v481_v3 }
 0x3ff   : > { %v484_v5 = vmul.f32 1.442695, %v483_v4 }
 0x401   : > { %1119 = vpow2.f32 %v484_v5 }
 0x404   : > { %v619_v6 = vpop.permute.xlu0 %618 }
 0x405   : > { %v621_v7 = vsub.f32 %v601_v43, %v619_v6 }
 0x407   : > { %v622_v8 = vmul.f32 1.442695, %v621_v7 }
 0x409   : > { %1121 = vpow2.f32 %v622_v8 }
 0x40b   : > { %v1120_v9 = vpop.eup %1119 }
 0x40c   : > { %v754_v10 = vpop.permute.xlu1 %753  ;;  %v489_v11 = vsel %vm275_vm0, %v1120_v9, 0.0  ;;  %v494_v22 = vpack.c.bf16 %v1120_v9, %v1120_v9  ;;  %v682_v9 = vld [vmem:[#allocation4 + $0x10] sm:$0xff] }
 0x40d   : > { %v756_v12 = vsub.f32 %v736_v48, %v754_v10  ;;  %490 = vadd.xlane.f32.xlu1 %v489_v11 }
 0x40f   : > { %v757_v13 = vmul.f32 1.442695, %v756_v12 }
 0x410   : > { %v499_v15 = vpop.permute.xlu1 %498 }
 0x411   : > { %1123 = vpow2.f32 %v757_v13  ;;  %v504_v19 = vsel %vm359_vm3, %v499_v15, 0  ;;  %350 = vadd.xlane.f32.xlu1 %v349_v18 }
 0x412   : > { %1050 = vmatpush3.bf16.msra.mxu0 %v504_v19  ;;  %1125 = vpow2.f32 %v476_v21  ;;  %v817_v19 = vld [vmem:[#allocation4 + $0x18] sm:$0xff] }
 0x413   : > { %v1122_v20 = vpop.eup %1121  ;;  %1061 = vmatprep.subr.bf16.mxu0 %v1165_v0  ;;  %1127 = vpow2.f32 %v614_v25 }
 0x414   : > { %v627_v23 = vsel %vm275_vm0, %v1122_v20, 0.0  ;;  %v634_v24 = vpop.permute.xlu1 %633  ;;  %v632_v29 = vpack.c.bf16 %v1122_v20, %v1122_v20  ;;  %1129 = vpow2.f32 %v337_v35 }
 0x415   : > { %628 = vadd.xlane.f32.xlu0 %v627_v23  ;;  %1052 = vmatmul.mubr.msk.bf16.vlgmr.msra.gmra.mrb[4].mxu0 %vm275_vm0, %v494_v22  ;;  %v639_v26 = vsel %vm359_vm3, %v634_v24, 0  ;;  %1131 = vpow2.f32 %v749_v37 }
 0x416   : > { %1062 = vmatpush3.bf16.msra.mxu0 %v639_v26  ;;  %1063 = vmatprep.mubr.msk.bf16.mxu0 %vm1166_vm1, %v1165_v0 }
 0x417   : > { %1073 = vmatprep.subr.bf16.mxu0 %v1165_v0 }
 0x418   : > { %v769_v27 = vpop.permute.xlu1 %768 }
 0x419   : > { %v774_v30 = vsel %vm359_vm3, %v769_v27, 0 }
 0x41b   : > { %v1124_v28 = vpop.eup %1123 }
 0x41c   : > { %v762_v31 = vsel %vm275_vm0, %v1124_v28, 0.0  ;;  %v1126_v32 = vpop.eup %1125  ;;  %v767_v33 = vpack.c.bf16 %v1124_v28, %v1124_v28 }
 0x41d   : > { %763 = vadd.xlane.f32.xlu0 %v762_v31  ;;  %1064 = vmatmul.mubr.msk.bf16.vlgmr.msra.gmra.mrb[8].mxu0 %vm275_vm0, %v632_v29  ;;  %v1128_v36 = vpop.eup %1127 }
 0x41e   : > { %1074 = vmatpush3.bf16.msra.mxu0 %v774_v30  ;;  %1075 = vmatprep.mubr.msk.bf16.mxu0 %vm1166_vm1, %v1165_v0  ;;  %v1130_v38 = vpop.eup %1129  ;;  %v488_v0 = vmul.f32 %v1126_v32, %v487_v40  ;;  %v626_v45 = vmul.f32 %v1128_v36, %v625_v17 }
 0x41f   : > { %v1132_v39 = vpop.eup %1131  ;;  %v348_v14 = vmul.f32 %v1130_v38, %v347_v42 }
 0x420   : > { %v761_v51 = vmul.f32 %v1132_v39, %v760_v49 }
 0x422   : > { %550 = vperm.xlu1 %1114, %v1126_v32  }
 0x425   : > { %1076 = vmatmul.mubr.msk.bf16.vlgmr.msra.gmra.mrb[12].mxu0 %vm275_vm0, %v767_v33 }
 0x426   : > { %685 = vperm.xlu1 %1114, %v1128_v36  }
 0x433   : > { %406 = vperm.xlu0 %1113, %v1130_v38  }
 0x437   : > { %820 = vperm.xlu0 %1113, %v1132_v39  }
 0x49a   : > { %v491_v41 = vpop.xlane.xlu1 %490 }
 0x49b   : > { %v492_v43 = vadd.f32 %v491_v41, %v488_v0 }
 0x49d   : > { %493 = vst.msk [vmem:[#allocation3 + $0x8] sm:$0xff] %vm266_vm2, %v492_v43 }
 0x49e   : > { %v351_v16 = vpop.xlane.xlu1 %350 }
 0x49f   : > { %v352_v44 = vadd.f32 %v351_v16, %v348_v14 }
 0x4a1   : > { %354 = vst.msk [vmem:[#allocation3] sm:$0xff] %vm266_vm2, %v352_v44 }
 0x4a2   : > { %v629_v46 = vpop.xlane.xlu0 %628  ;;  %v551_v2 = vpop.permute.xlu1 %550 }
 0x4a3   : > { %v630_v47 = vadd.f32 %v629_v46, %v626_v45  ;;  %v553_v3 = vmul.f32 %v551_v2, %v547_v1 }
 0x4a4   : > { %v839_v48 = vld [vmem:[#allocation3 + $0x8] sm:$0xff] }
 0x4a5   : > { %631 = vst.msk [vmem:[#allocation3 + $0x10] sm:$0xff] %vm266_vm2, %v630_v47  ;;  %1133 = vrcp.f32 %v839_v48 }
 0x4a6   : > { %v686_v10 = vpop.permute.xlu1 %685 }
 0x4a8   : > { %v830_v50 = vld [vmem:[#allocation3] sm:$0xff] }
 0x4a9   : > { %1135 = vrcp.f32 %v830_v50 }
 0x4aa   : > { %v764_v52 = vpop.xlane.xlu0 %763 }
 0x4ab   : > { %v765_v53 = vadd.f32 %v764_v52, %v761_v51 }
 0x4ac   : > { %v848_v54 = vld [vmem:[#allocation3 + $0x10] sm:$0xff] }
 0x4ad   : > { %766 = vst.msk [vmem:[#allocation3 + $0x18] sm:$0xff] %vm266_vm2, %v765_v53  ;;  %1137 = vrcp.f32 %v848_v54 }
 0x4af   : > { %v1134_v55 = vpop.eup %1133 }
 0x4b0   : > { %844 = vperm.xlu0 %1113, %v1134_v55  }
 0x4b2   : > { %v407_v57 = vpop.permute.xlu0 %406 }
 0x4b3   : > { %v1136_v58 = vpop.eup %1135  ;;  %v409_v59 = vmul.f32 %v407_v57, %v403_v56 }
 0x4b4   : > { %835 = vperm.xlu1 %1114, %v1136_v58   ;;  %v857_v60 = vld [vmem:[#allocation3 + $0x18] sm:$0xff] }
 0x4b5   : > { %v410_v61 = vadd.f32 %v409_v59, %v1299_v34  ;;  %1139 = vrcp.f32 %v857_v60  ;;  %v688_v34 = vmul.f32 %v686_v10, %v682_v9 }
 0x4b6   : > { %v821_v20 = vpop.permute.xlu0 %820 }
 0x4b7   : > { %v1138_v62 = vpop.eup %1137  ;;  %411 = vst.msk [vmem:[#allocation4] sm:$0xff] %vm275_vm0, %v410_v61  ;;  %v823_v21 = vmul.f32 %v821_v20, %v817_v19 }
 0x4b8   : > { %853 = vperm.xlu1 %1114, %v1138_v62  }
 0x4be   : > { %v832_v38 = vld [vmem:[#allocation4] sm:$0xff] }
 0x4bf   : > { %v1140_v63 = vpop.eup %1139 }
 0x4c0   : > { %862 = vperm.xlu0 %1113, %v1140_v63  }
 0x4e8   : > { %v540_v4 = vpop.f32.mrb[4].mxu0 }
 0x4e9   : > { %v554_v5 = vadd.f32 %v553_v3, %v540_v4  ;;  %v1053_v6 = vpop.f32.mrb[5].mxu0 }
 0x4ea   : > { %v543_v7 = vpop.f32.mrb[6].mxu0 }
 0x4eb   : > { %555 = vst.msk [vmem:[#allocation4 + $0x8] sm:$0xff] %vm275_vm0, %v554_v5  ;;  %v1054_v8 = vpop.f32.mrb[7].mxu0 }
 0x4f0   : > { %v675_v11 = vpop.f32.mrb[8].mxu0 }
 0x4f1   : > { %v689_v12 = vadd.f32 %v688_v34, %v675_v11  ;;  %v1065_v13 = vpop.f32.mrb[9].mxu0 }
 0x4f2   : > { %v678_v15 = vpop.f32.mrb[10].mxu0  ;;  %v841_v28 = vld [vmem:[#allocation4 + $0x8] sm:$0xff] }
 0x4f3   : > { %690 = vst.msk [vmem:[#allocation4 + $0x10] sm:$0xff] %vm275_vm0, %v689_v12  ;;  %v1066_v18 = vpop.f32.mrb[11].mxu0 }
 0x4f8   : > { %v810_v22 = vpop.f32.mrb[12].mxu0 }
 0x4f9   : > { %v824_v23 = vadd.f32 %v823_v21, %v810_v22  ;;  %v1077_v24 = vpop.f32.mrb[13].mxu0 }
 0x4fa   : > { %v813_v26 = vpop.f32.mrb[14].mxu0  ;;  %v850_v32 = vld [vmem:[#allocation4 + $0x10] sm:$0xff] }
 0x4fb   : > { %825 = vst.msk [vmem:[#allocation4 + $0x18] sm:$0xff] %vm275_vm0, %v824_v23  ;;  %v1078_v25 = vpop.f32.mrb[15].mxu0 }
 0x502   : > { %v859_v36 = vld [vmem:[#allocation4 + $0x18] sm:$0xff] }
 0x52f   : > { %v845_v27 = vpop.permute.xlu0 %844 }
 0x530   : > { %v847_v29 = vmul.f32 %v845_v27, %v841_v28 }
 0x532   : > { %867 = vrot.lane.b32.xlu1 %v847_v29, %s1172_s29 }
 0x533   : > { %v836_v30 = vpop.permute.xlu1 %835 }
 0x534   : > { %v838_v40 = vmul.f32 %v836_v30, %v832_v38 }
 0x537   : > { %v854_v31 = vpop.permute.xlu1 %853 }
 0x538   : > { %v856_v33 = vmul.f32 %v854_v31, %v850_v32 }
 0x53a   : > { %871 = vrot.lane.b32.xlu0 %v856_v33, %s1173_s30 }
 0x53f   : > { %v863_v35 = vpop.permute.xlu0 %862 }
 0x540   : > { %v865_v37 = vmul.f32 %v863_v35, %v859_v36 }
 0x542   : > { %875 = vrot.lane.b32.xlu1 %v865_v37, %s1174_s4 }
 0x5a4   : > { %v868_v39 = vpop.permute.xlu1 %867 }
 0x5a5   : > { %v878_v41 = vsel %vm275_vm0, %v838_v40, %v868_v39 }
 0x5ac   : > { %v872_v0 = vpop.permute.xlu0 %871 }
 0x5ad   : > { %v880_v42 = vsel %vm879_vm4, %v878_v41, %v872_v0 }
 0x5b4   : > { %v876_v43 = vpop.permute.xlu1 %875 }
 0x5b5   : > { %v882_v14 = vsel %vm881_vm5, %v880_v42, %v876_v43 }
 0x5b6   : > { %v883_v16 = vpack.c.bf16 %v882_v14, %v882_v14 }
 0x5b8   : > { %885 = vst.msk [vmem:[%s259_s7] sm:$0xf] %vm884_vm6, %v883_v16 }
 0x5b9 PF: > { %s13_s14 = sadd.s32 1, %s1163_s14   ;;  %s1359_s12 = smov %s1159_s13 }
 0x5ba   : > { %p10_p5 = scmp.ge.s32.totalorder %s13_s14, 4   ;;  %s1360_s13 = smov %s1362_s15 }
 0x5bc   :  { %12 = sbr.rel (!%p10_p5) target bundleno = 2 (0x2), region = 85 }

</bundles_post_ra>
